<compile_context>
chip_gen: v6e
topology: v6e:2x2x1
jax: 0.10.0
libtpu: 0.0.40
codegen_flags: <defaults>
</compile_context>

<pallas_src>
import jax
import jax.numpy as jnp
from jax.experimental import pallas as pl
from jax.experimental.pallas import tpu as pltpu


# ----------------------------------------------------------------------------
# Tiling helper
# ----------------------------------------------------------------------------
def _pick_tile_hw(hw):
    # Largest lane-friendly pixel tile (multiple of 128) that still gives >= 2
    # grid steps per image.  Real resolutions (e.g. 512x512 -> HW=262144) pick
    # 512; the toy 16x16 image picks 128 (2 tiles).  Per-step VMEM is
    #   2 * TILE_HW * (9*Cin) * 2B   (bf16 patches, double buffered)
    # + 2 * TILE_HW * NC * 4B        (f32 logits)
    # i.e. well under v7x's 64 MiB VMEM budget.
    for t in (512, 256, 128):
        if hw % t == 0 and hw // t >= 2:
            return t
    return hw


# ----------------------------------------------------------------------------
# Pallas kernel: fused (3x3 conv as transposed im2col matmul + bias + ReLU)
#                -> (1x1 conv + bias), channels-major so stores are lane-dense
# ----------------------------------------------------------------------------
def _seg_head_kernel(p_ref, w1_ref, b1_ref, w2_ref, b2_ref, o_ref):
    # p_ref : (1, K, T)   bf16  transposed im2col patches (K = 9*Cin, T pixels)
    # w1_ref: (Ch, K)     bf16  3x3 conv weights, transposed
    # b1_ref: (Ch, 1)     f32
    # w2_ref: (NC, Ch)    bf16  1x1 classifier weights, transposed
    # b2_ref: (NC, 1)     f32
    # o_ref : (1, NC, T)  f32   per-pixel class logits, channels-major (NCHW)
    p = p_ref[0]                                                      # (K, T)
    h = jnp.dot(w1_ref[...], p,
                preferred_element_type=jnp.float32)                   # (Ch, T)
    h = jnp.maximum(h + b1_ref[...], 0.0)                             # bias + ReLU (f32)
    logits = jnp.dot(w2_ref[...], h.astype(jnp.bfloat16),
                     preferred_element_type=jnp.float32)              # (NC, T)
    o_ref[0] = (logits + b2_ref[...]).astype(o_ref.dtype)


def _seg_head_pallas(patches_t, w1_t, b1_c, w2_t, b2_c):
    B, K, HW = patches_t.shape
    Ch = w1_t.shape[0]
    NC = w2_t.shape[0]
    T = _pick_tile_hw(HW)
    assert HW % T == 0
    n_tiles = HW // T

    return pl.pallas_call(
        _seg_head_kernel,
        out_shape=jax.ShapeDtypeStruct((B, NC, HW), jnp.float32),
        grid=(B, n_tiles),
        in_specs=[
            pl.BlockSpec((1, K, T), lambda b, t: (b, 0, t)),   # patches tile
            pl.BlockSpec((Ch, K), lambda b, t: (0, 0)),        # stationary weights
            pl.BlockSpec((Ch, 1), lambda b, t: (0, 0)),
            pl.BlockSpec((NC, Ch), lambda b, t: (0, 0)),
            pl.BlockSpec((NC, 1), lambda b, t: (0, 0)),
        ],
        out_specs=pl.BlockSpec((1, NC, T), lambda b, t: (b, 0, t)),
        compiler_params=pltpu.CompilerParams(
            dimension_semantics=("parallel", "parallel"),
            vmem_limit_bytes=32 * 1024 * 1024,
            allow_input_fusion=[True, False, False, False, False],
        ),
    )(patches_t, w1_t, b1_c, w2_t, b2_c)


# ----------------------------------------------------------------------------
# Synthetic segmentation "model" (the thing the wrapper calls): returns a dict
# with key 'out', exactly like torchvision segmentation models.
# ----------------------------------------------------------------------------
def synthetic_segmentation_model(x_nchw, params):
    w1, b1, w2, b2 = params        # w1: (3,3,Cin,Ch) HWIO, w2: (Ch, NC)
    B, Cin, H, W = x_nchw.shape
    Ch = w1.shape[-1]
    NC = w2.shape[-1]

    # Pad spatially once (SAME padding for the 3x3 conv), stay channels-first.
    xf = x_nchw.astype(jnp.float32)
    xp = jnp.pad(xf, ((0, 0), (0, 0), (1, 1), (1, 1)))    # (B, Cin, H+2, W+2)

    # Transposed im2col: (B, 9*Cin, H*W), (dy, dx, c)-major rows to match the
    # row-major flatten of w1.  bf16 halves the HBM bytes of this stream.
    shifts = [xp[:, :, dy:dy + H, dx:dx + W]
              for dy in range(3) for dx in range(3)]       # 9 x (B, Cin, H, W)
    patches_t = jnp.stack(shifts, axis=1)                  # (B, 9, Cin, H, W)
    patches_t = patches_t.reshape(B, 9 * Cin, H * W).astype(jnp.bfloat16)

    w1_t = jnp.transpose(w1.reshape(9 * Cin, Ch)).astype(jnp.bfloat16)  # (Ch, 9*Cin)
    w2_t = jnp.transpose(w2).astype(jnp.bfloat16)                        # (NC, Ch)
    b1_c = b1.reshape(Ch, 1).astype(jnp.float32)
    b2_c = b2.reshape(NC, 1).astype(jnp.float32)

    out_flat = _seg_head_pallas(patches_t, w1_t, b1_c, w2_t, b2_c)  # (B, NC, HW)
    # Channels-major already == NCHW; reshape is free (no transpose needed).
    return {"out": out_flat.reshape(B, NC, H, W)}


# ----------------------------------------------------------------------------
# The SegmentationModelOutputWrapper forward: model(x)['out']
# ----------------------------------------------------------------------------
def segmentation_model_output_wrapper_forward(x_nchw, params):
    return synthetic_segmentation_model(x_nchw, params)["out"]


# ----------------------------------------------------------------------------
# Pure-JAX fp32 reference (lax.conv) for a correctness sanity check.
# ----------------------------------------------------------------------------
def _reference_forward(x_nchw, params):
    w1, b1, w2, b2 = params
    w1_oihw = jnp.transpose(w1, (3, 2, 0, 1))
    h = jax.lax.conv_general_dilated(
        x_nchw.astype(jnp.float32), w1_oihw, window_strides=(1, 1),
        padding="SAME", dimension_numbers=("NCHW", "OIHW", "NCHW"))
    h = jnp.maximum(h + b1[None, :, None, None], 0.0)
    w2_oihw = jnp.transpose(w2, (1, 0))[:, :, None, None]
    out = jax.lax.conv_general_dilated(
        h, w2_oihw, window_strides=(1, 1),
        padding="SAME", dimension_numbers=("NCHW", "OIHW", "NCHW"))
    return out + b2[None, :, None, None]


if __name__ == "__main__":
    # Small shapes consistent with a segmentation forward pass.
    B, Cin, H, W = 2, 4, 16, 16
    hidden, num_classes = 32, 8

    key = jax.random.PRNGKey(0)
    k_x, k_w1, k_b1, k_w2, k_b2 = jax.random.split(key, 5)

    x = jax.random.normal(k_x, (B, Cin, H, W), dtype=jnp.float32)
    w1 = jax.random.normal(k_w1, (3, 3, Cin, hidden), dtype=jnp.float32) * 0.1
    b1 = jax.random.normal(k_b1, (hidden,), dtype=jnp.float32) * 0.1
    w2 = jax.random.normal(k_w2, (hidden, num_classes), dtype=jnp.float32) * 0.1
    b2 = jax.random.normal(k_b2, (num_classes,), dtype=jnp.float32) * 0.1
    params = (w1, b1, w2, b2)

    out = jax.jit(segmentation_model_output_wrapper_forward)(x, params)
    out = jax.block_until_ready(out)

    assert out.shape == (B, num_classes, H, W), out.shape

    ref = jax.block_until_ready(_reference_forward(x, params))
    # bf16 MXU operands (fp32 accumulation) -> loosened tolerance vs fp32 ref.
    assert jnp.allclose(out, ref, atol=5e-2, rtol=5e-2), \
        float(jnp.max(jnp.abs(out - ref)))

    print("KERNEL_OK")
</pallas_src>

<mosaic_0001>
module attributes {stable_mosaic.version = 11 : i64} {
  func.func @_seg_head_kernel(%arg0: i32, %arg1: i32, %arg2: memref<1x36x128xbf16, #tpu.memory_space<vmem>>, %arg3: memref<32x36xbf16, #tpu.memory_space<vmem>>, %arg4: memref<32x1xf32, #tpu.memory_space<vmem>>, %arg5: memref<8x32xbf16, #tpu.memory_space<vmem>>, %arg6: memref<8x1xf32, #tpu.memory_space<vmem>>, %arg7: memref<1x8x128xf32, #tpu.memory_space<vmem>>) attributes {dimension_semantics = [#tpu.dimension_semantics<parallel>, #tpu.dimension_semantics<parallel>], iteration_bounds = array<i64: 2, 2>, scalar_prefetch = 0 : i64, scratch_operands = 0 : i64, tpu.core_type = #tpu.core_type<tc>, window_params = [{transform_indices = @transform_0, window_bounds = array<i64: 1, 36, 128>}, {pipeline_mode = #tpu.pipeline_mode<synchronous>, transform_indices = @transform_1, window_bounds = array<i64: 32, 36>}, {pipeline_mode = #tpu.pipeline_mode<synchronous>, transform_indices = @transform_2, window_bounds = array<i64: 32, 1>}, {pipeline_mode = #tpu.pipeline_mode<synchronous>, transform_indices = @transform_3, window_bounds = array<i64: 8, 32>}, {pipeline_mode = #tpu.pipeline_mode<synchronous>, transform_indices = @transform_4, window_bounds = array<i64: 8, 1>}, {transform_indices = @transform_5, window_bounds = array<i64: 1, 8, 128>}]} {
    %c0 = arith.constant 0 : index
    %c0_0 = arith.constant 0 : index
    %c0_1 = arith.constant 0 : index
    %0 = vector.load %arg2[%c0, %c0_0, %c0_1] : memref<1x36x128xbf16, #tpu.memory_space<vmem>>, vector<1x36x128xbf16>
    %1 = vector.shape_cast %0 : vector<1x36x128xbf16> to vector<36x128xbf16>
    %c0_2 = arith.constant 0 : index
    %c0_3 = arith.constant 0 : index
    %2 = vector.load %arg3[%c0_2, %c0_3] : memref<32x36xbf16, #tpu.memory_space<vmem>>, vector<32x36xbf16>
    %cst = arith.constant dense<0.000000e+00> : vector<32x128xf32>
    %3 = tpu.matmul %2, %1, %cst {dimension_numbers = #tpu.dot_dimension_numbers<[1], [0], [0], [1], [0, 0, 1, 1], [], []>} : vector<32x36xbf16>, vector<36x128xbf16>, vector<32x128xf32> -> vector<32x128xf32>
    %c0_4 = arith.constant 0 : index
    %c0_5 = arith.constant 0 : index
    %4 = vector.load %arg4[%c0_4, %c0_5] : memref<32x1xf32, #tpu.memory_space<vmem>>, vector<32x1xf32>
    %5 = vector.broadcast %4 : vector<32x1xf32> to vector<32x128xf32>
    %6 = arith.addf %3, %5 : vector<32x128xf32>
    %cst_6 = arith.constant 0.000000e+00 : f32
    %7 = vector.broadcast %cst_6 : f32 to vector<32x128xf32>
    %8 = arith.maximumf %6, %7 : vector<32x128xf32>
    %c0_7 = arith.constant 0 : index
    %c0_8 = arith.constant 0 : index
    %9 = vector.load %arg5[%c0_7, %c0_8] : memref<8x32xbf16, #tpu.memory_space<vmem>>, vector<8x32xbf16>
    %10 = arith.truncf %8 : vector<32x128xf32> to vector<32x128xbf16>
    %cst_9 = arith.constant dense<0.000000e+00> : vector<8x128xf32>
    %11 = tpu.matmul %9, %10, %cst_9 {dimension_numbers = #tpu.dot_dimension_numbers<[1], [0], [0], [1], [0, 0, 1, 1], [], []>} : vector<8x32xbf16>, vector<32x128xbf16>, vector<8x128xf32> -> vector<8x128xf32>
    %c0_10 = arith.constant 0 : index
    %c0_11 = arith.constant 0 : index
    %12 = vector.load %arg6[%c0_10, %c0_11] : memref<8x1xf32, #tpu.memory_space<vmem>>, vector<8x1xf32>
    %13 = vector.broadcast %12 : vector<8x1xf32> to vector<8x128xf32>
    %14 = arith.addf %11, %13 : vector<8x128xf32>
    %c0_12 = arith.constant 0 : index
    %c0_13 = arith.constant 0 : index
    %c0_14 = arith.constant 0 : index
    %15 = vector.load %arg7[%c0_12, %c0_13, %c0_14] : memref<1x8x128xf32, #tpu.memory_space<vmem>>, vector<1x8x128xf32>
    %16 = vector.shape_cast %15 : vector<1x8x128xf32> to vector<8x128xf32>
    %17 = vector.shape_cast %14 : vector<8x128xf32> to vector<1x8x128xf32>
    tpu.vector_store %arg7[%c0_12, %c0_13, %c0_14], %17 {strides = array<i32>} : memref<1x8x128xf32, #tpu.memory_space<vmem>>, vector<1x8x128xf32>,
    return
  }
  func.func @transform_0(%arg0: i32, %arg1: i32) -> (i32, i32, i32) {
    %c0_i32 = arith.constant 0 : i32
    %c0_i32_0 = arith.constant 0 : i32
    return %arg0, %c0_i32, %arg1 : i32, i32, i32
  }
  func.func @transform_1(%arg0: i32, %arg1: i32) -> (i32, i32) {
    %c0_i32 = arith.constant 0 : i32
    %c0_i32_0 = arith.constant 0 : i32
    %c0_i32_1 = arith.constant 0 : i32
    return %c0_i32, %c0_i32_0 : i32, i32
  }
  func.func @transform_2(%arg0: i32, %arg1: i32) -> (i32, i32) {
    %c0_i32 = arith.constant 0 : i32
    %c0_i32_0 = arith.constant 0 : i32
    %c0_i32_1 = arith.constant 0 : i32
    return %c0_i32, %c0_i32_0 : i32, i32
  }
  func.func @transform_3(%arg0: i32, %arg1: i32) -> (i32, i32) {
    %c0_i32 = arith.constant 0 : i32
    %c0_i32_0 = arith.constant 0 : i32
    %c0_i32_1 = arith.constant 0 : i32
    return %c0_i32, %c0_i32_0 : i32, i32
  }
  func.func @transform_4(%arg0: i32, %arg1: i32) -> (i32, i32) {
    %c0_i32 = arith.constant 0 : i32
    %c0_i32_0 = arith.constant 0 : i32
    %c0_i32_1 = arith.constant 0 : i32
    return %c0_i32, %c0_i32_0 : i32, i32
  }
  func.func @transform_5(%arg0: i32, %arg1: i32) -> (i32, i32, i32) {
    %c0_i32 = arith.constant 0 : i32
    %c0_i32_0 = arith.constant 0 : i32
    return %arg0, %c0_i32, %arg1 : i32, i32, i32
  }
}

</mosaic_0001>

<bundles_post_ra>
// kernel: segmentation_model_output_wrapper_forward.1
= control target key start
LH: loop header
LB: loop body
LE: loop exit
PB: predicated region body
PF: predicated region fallthrough
CT: control target
= control target key end

     0   :  { %s776_s18 = smov 0   ;;  %s778_s19 = smov 0   ;;  %s893_s0 = inlined_call_operand.vmem [shape: bf16[2,36,256], index: 0, kind: input, shape index: {}]   ;;  %s894_s1 = inlined_call_operand.vmem [shape: bf16[32,36], index: 1, kind: input, shape index: {}]   ;;  %s895_s2 = inlined_call_operand.vmem [shape: f32[32,1], index: 2, kind: input, shape index: {}]   ;;  %s896_s3 = inlined_call_operand.vmem [shape: bf16[8,32], index: 3, kind: input, shape index: {}]   ;;  %s897_s4 = inlined_call_operand.vmem [shape: f32[8,1], index: 4, kind: input, shape index: {}]   ;;  %s898_s5 = inlined_call_operand.vmem [shape: f32[2,8,256], index: 5, kind: output, shape index: {}]  }
   0x1   :  { %s780_s20 = smov 0   ;;  %s782_s21 = smov 0  }
   0x2   :  { %s784_s22 = smov 0   ;;  %s786_s23 = smov 0  }
   0x3   :  { %s788_s24 = smov 0  }
   0x4 LB: > { %s24_s25 = sadd.s32 1, %s733_s22  ;;  %s27_s26 = sadd.s32 1, %s737_s23  ;;  %s741_s24 = sphi %s788_s24, %s15_s24   ;;  %s737_s23 = sphi %s786_s23, %s904_s23   ;;  %s733_s22 = sphi %s784_s22, %s903_s22   ;;  %s729_s21 = sphi %s782_s21, %s902_s21   ;;  %s725_s20 = sphi %s780_s20, %s901_s20   ;;  %s721_s19 = sphi %s778_s19, %s900_s19   ;;  %s717_s18 = sphi %s776_s18, %s899_s18  }
   0x5   : > { %p25_p0 = scmp.ge.s32.totalorder %s24_s25, 2  ;;  %p43_p1 = scmp.ne.s32.totalorder %s721_s19, %s717_s18 }
   0x6   : > { %p44_p2 = scmp.eq.s32.totalorder %s741_s24, 0  ;;  %s36_s30 = sadd.s32 1, %s721_s19 }
   0x7   : > { %s906_s25 = smov (%p25_p0, %s24_s25), 0  ;;  %s908_s26 = smov (!%p25_p0, %s27_s26), %s737_s23 }
   0x8   : > { %p45_p3 = por %p44_p2, %p43_p1  ;;  %p29_p4 = scmp.ge.s32.totalorder %s908_s26, 2 }
   0x9   : > { %s32_s27 = ssub.s32 %s733_s22, %s906_s25  ;;  %p576_p6 = scmp.ge.s32.totalorder %s741_s24, 4 }
   0xa   : > { %s910_s26 = smov (%p29_p4, %s908_s26), 0 }
   0xb   : > { %s31_s28 = ssub.s32 %s737_s23, %s910_s26  ;;  %193 = sbr.rel (%p576_p6) target bundleno = 26 (0x1a), region = 32 }
   0xc   : > { %s33_s29 = sor.u32 %s32_s27, %s31_s28 }
   0xd   : > { %p34_p5 = scmp.eq.s32.totalorder %s33_s29, 0 }
   0xf   : > { %s827_s6 = scalar_select %p34_p5, %s721_s19, %s36_s30  }
  0x10   : > { %196 = sbr.rel (!%p45_p3) target bundleno = 26 (0x1a), region = 36  ;;  %s198_s7 = sand.u32 (%p45_p3), 1, %s721_s19  }
  0x11   : > { %s619_s8 = smul.u32 (%p45_p3), 10, %s737_s23 }
  0x12   : > { %s618_s9 = smul.u32 (%p45_p3), 20, %s198_s7 }
  0x13   : > { %s202_s10 = sadd.s32 (%p45_p3), %s733_s22, %s619_s8 }
  0x14   : > { %s577_s11 = sshll.u32 (%p45_p3), %s202_s10, 2  ;;  %s200_s15 = scalar_lea.vmem (%p45_p3), [#allocation2], %s618_s9 }
  0x15   : > { %s204_s14 = scalar_lea.vmem %s893_s0, %s577_s11 }
  0x16   : > { %v221_v0 = vld [vmem:[%s204_s14] sm:$0xf]  ;;  %v223_v1 = vld [vmem:[%s204_s14 + $0x8] sm:$0xf]  ;;  %v225_v2 = vld [vmem:[%s204_s14 + $0x10] sm:$0xf] }
  0x17   : > { %222 = vst [vmem:[%s200_s15] sm:$0xf] %v221_v0  ;;  %224 = vst [vmem:[%s200_s15 + $0x4] sm:$0xf] %v223_v1  ;;  %v227_v3 = vld [vmem:[%s204_s14 + $0x18] sm:$0xf] }
  0x18   : > { %226 = vst [vmem:[%s200_s15 + $0x8] sm:$0xf] %v225_v2  ;;  %v229_v4 = vld [vmem:[%s204_s14 + $0x20] sm:$0xf]  ;;  %228 = vst [vmem:[%s200_s15 + $0xc] sm:$0xf] %v227_v3 }
  0x19   : > { %230 = vst [vmem:[%s200_s15 + $0x10] sm:$0xf] %v229_v4 }
  0x1a PF: > { %p578_p7 = scmp.ge.s32.totalorder %s741_s24, 1  ;;  %p263_p8 = scmp.lt.s32.totalorder %s741_s24, 5 }
  0x1c   : > { %p264_p9 = pnand %p578_p7, %p263_p8 }
  0x1d   : > { %s270_s16 = sand.u32 (!%p264_p9), 1, %s717_s18   ;;  %p300_p10 = scmp.lt.s32.totalorder (!%p264_p9), %s729_s21, 1 }
  0x1e   : > { %267 = sbr.rel (%p264_p9) target bundleno = 459 (0x1cb), region = 77  ;;  %p302_p11 = scmp.lt.s32.totalorder (!%p264_p9), %s725_s20, 1 }
  0x1f   : > { %s620_s17 = smul.u32 (!%p264_p9), 20, %s270_s16 }
  0x21   : > { %s272_s10 = scalar_lea.vmem (!%p264_p9), [#allocation2], %s620_s17 }
  0x23   : > { %v685_v5 = vld [vmem:[%s894_s1] sm:$0xff]   ;;  %vm367_vm0 = vcmask 293888   ;;  %v320_v6 = vld [vmem:[%s895_s2 + $0x10] sm:$0xff]  ;;  %vm374_vm1 = vcmask 1041408   ;;  %v743_v7 = vmov 0   ;;  %v321_v8 = vld [vmem:[%s895_s2 + $0x18] sm:$0xff] }
  0x24   : > { %605 = vmatprep.mubr.msk.bf16.mxu0 %vm367_vm0, %v685_v5  ;;  %680 = vset.pattern.permute.xlu0 %v743_v7  ;;  %v318_v9 = vld [vmem:[%s895_s2] sm:$0xff]  ;;  %v319_v13 = vld [vmem:[%s895_s2 + $0x8] sm:$0xff]  ;;  %v744_v17 = vmov 0.0   ;;  %vm745_vm2 = vmmov 0   ;;  %vm440_vm3 = vcmask 261120   ;;  %s912_s21 = smov (!%p300_p10, %s729_s21), 1 }
  0x25   : > { %v682_v10 = vld [vmem:[%s272_s10 + $0x10] ss:$0 sps:$4 sm:$0x33]   ;;  %v683_v11 = vld [vmem:[%s272_s10 + $0x8] sm:$0xff]   ;;  %334 = vperm.xlu0 %680, %v320_v6   ;;  %681 = vset.pattern.permute.xlu1 %v743_v7  ;;  %v684_v14 = vld [vmem:[%s272_s10] sm:$0xff]   ;;  %s914_s20 = smov (!%p302_p11, %s725_s20), 1 }
  0x26   : > { %324 = vperm.xlu1 %681, %v318_v9   ;;  %617 = vmatprep.subr.msk.bf16.mxu0 %vm374_vm1, %v682_v10  ;;  %v376_v12 = vsel %vm374_vm1, %v682_v10, 0  ;;  %v434_v15 = vld [vmem:[%s897_s4] sm:$0xff]  ;;  %v686_v16 = vld [vmem:[%s894_s1 + $0x8] sm:$0xff]   ;;  %s579_s28 = sshll.u32 %s912_s21, 1 }
  0x27   : > { %600 = vmatpush3.bf16.msra.mxu0 %v376_v12  ;;  %609 = vmatprep.subr.bf16.mxu1 %v744_v17  ;;  %v431_v36 = vld [vmem:[%s896_s3] sm:$0xf]  ;;  %s305_s29 = sadd.s32 %s579_s28, %s914_s20 }
  0x28   : > { %601 = vmatprep.subr.bf16.mxu0 %v683_v11  ;;  %613 = vmatprep.mubr.msk.bf16.mxu1 %vm745_vm2, %v744_v17  ;;  %s580_s30 = sshll.u32 %s305_s29, 3 }
  0x29   : > { %339 = vperm.xlu0 %680, %v321_v8   ;;  %s307_s18 = scalar_lea.vmem %s898_s5, %s580_s30 }
  0x2a   : > { %329 = vperm.xlu1 %681, %v319_v13  }
  0x2b   : > { %602 = vmatpush3.bf16.msra.mxu0 %v683_v11 }
  0x2c   : > { %603 = vmatprep.subr.bf16.mxu0 %v684_v14 }
  0x2d   : > { %437 = vperm.xlu0 %680, %v434_v15  }
  0x2f   : > { %604 = vmatpush3.bf16.msra.mxu0 %v684_v14 }
  0x32   : > { %606 = vmatmul.mubr.msk.bf16.vlgmr.msra.gmra.mxu0 %vm367_vm0, %v686_v16 }
  0xa0   : > { %v335_v18 = vpop.permute.xlu0 %334 }
  0xa1   : > { %v325_v19 = vpop.permute.xlu1 %324 }
  0xa4   : > { %v340_v23 = vpop.permute.xlu0 %339 }
  0xa5   : > { %v330_v26 = vpop.permute.xlu1 %329 }
  0xa8   : > { %v438_v37 = vpop.permute.xlu0 %437 }
  0xf2   : > { %v607_v20 = vpop.f32.mrf.mxu0 }
  0xf3   : > { %v421_v22 = vadd.f32 %v607_v20, %v335_v18 }
  0xf4   : > { %v412_v21 = vpop.f32.mrf.mxu0 }
  0xf5   : > { %v429_v28 = vmax.f32 %v421_v22, 0.0  ;;  %v413_v29 = vadd.f32 %v412_v21, %v325_v19 }
  0xf6   : > { %v608_v24 = vpop.f32.mrf.mxu0 }
  0xf7   : > { %v424_v25 = vadd.f32 %v608_v24, %v340_v23  ;;  %v427_v34 = vmax.f32 %v413_v29, 0.0 }
  0xf8   : > { %v415_v27 = vpop.f32.mrf.mxu0 }
  0xf9   : > { %v430_v30 = vmax.f32 %v424_v25, 0.0  ;;  %v416_v31 = vadd.f32 %v415_v27, %v330_v26 }
  0xfb   : > { %v428_v32 = vmax.f32 %v416_v31, 0.0  ;;  %v433_v33 = vpack.c.bf16 %v430_v30, %v429_v28 }
  0xfd   : > { %610 = vmatpush3.bf16.msra.mxu1 %v433_v33  ;;  %v432_v35 = vpack.c.bf16 %v428_v32, %v427_v34 }
  0xfe   : > { %611 = vmatprep.subr.bf16.mxu1 %v744_v17 }
 0x101   : > { %612 = vmatpush3.bf16.msra.mxu1 %v432_v35 }
 0x104   : > { %614 = vmatmul.mubr.msk.bf16.vlgmr.msra.gmra.mxu1 %vm440_vm3, %v431_v36 }
 0x1c4   : > { %v478_v38 = vpop.f32.mrf.mxu1 }
 0x1c5   : > { %v479_v39 = vadd.f32 %v478_v38, %v438_v37 }
 0x1c6   : > { %v615_v40 = vpop.f32.mrf.mxu1 }
 0x1c7   : > { %484 = vst [vmem:[%s307_s18] sm:$0xff] %v479_v39 }
 0x1c8   : > { %v481_v41 = vpop.f32.mrf.mxu1 }
 0x1ca   : > { %v616_v42 = vpop.f32.mrf.mxu1 }
 0x1cb PF: > { %s15_s24 = sadd.s32 1, %s741_s24   ;;  %s899_s18 = smov %s721_s19 }
 0x1cc   : > { %p12_p12 = scmp.ge.s32.totalorder %s15_s24, 6   ;;  %s900_s19 = smov %s827_s6 }
 0x1cd   : > { %s901_s20 = smov %s733_s22  ;;  %s902_s21 = smov %s737_s23 }
 0x1ce   : > { %s903_s22 = smov %s906_s25  ;;  %s904_s23 = smov %s910_s26 }
 0x1cf   :  { %14 = sbr.rel (!%p12_p12) target bundleno = 4 (0x4), region = 116 }

</bundles_post_ra>
